<compile_context>
chip_gen: v7x
topology: tpu7x:2x2x1
jax: 0.10.0
libtpu: 0.0.40
codegen_flags: <defaults>
</compile_context>

<pallas_src>
import functools

import jax
import jax.numpy as jnp
from jax import lax
from jax.experimental import pallas as pl
from jax.experimental.pallas import tpu as pltpu


def _round_up(x, m):
    return (x + m - 1) // m * m


def _vmem_limit_bytes(nbytes):
    """Generation-aware scoped-VMEM limit: enough for our (double-buffered)
    buffers + headroom, capped at ~3/4 of physical per-TC VMEM."""
    try:
        cap = int(pltpu.get_tpu_info().vmem_capacity_bytes)
    except Exception:
        cap = 64 << 20            # conservative (v7x per-TC physical)
    ceiling = max((cap * 3) // 4, 32 << 20)
    want = 2 * int(nbytes) + (8 << 20)
    return int(min(max(want, 32 << 20), ceiling))


def _pick_vocab_tile(nwp):
    """Largest lane tile (<=2048) whose over-padding is <= nwords/8."""
    for t in (2048, 1024, 512, 256, 128):
        if _round_up(nwp, t) - nwp <= nwp // 8:
            return t
    return 128


# --------------------- kernel 1: GRU step + memory hops --------------------- #
def decoder_state_kernel(mem_ref, emby_ref, hprev_ref, wg_ref, bg_ref,
                         pptr_ref, hout_ref, qo_ref, *, m_valid: int):
    """All-VMEM-resident state computation (single invocation, no grid).

    mem_ref   : (hops+1, B, Mp, Ep) bf16   stacked memories (zero padded)
    emby_ref  : (B, Ep)   f32              C[0](y_)
    hprev_ref : (B, Ep)   f32              previous GRU hidden state
    wg_ref    : (2Ep, 4Ep) f32   fused GRU weight, column blocks:
                                 [r combined | z combined | n-input | n-hidden]
    bg_ref    : (1, 4Ep)  f32    matching fused biases
    outputs:
      pptr_ref : (B, Mp)   f32   last hop's PRE-softmax scores (p_ptr)
      hout_ref : (B, Ep)   f32   new hidden state
      qo_ref   : (B, 2Ep)  bf16  concat(q0, o0) -> consumed by the vocab kernel
    """
    Ep = emby_ref.shape[1]
    Mp = mem_ref.shape[2]
    hops = mem_ref.shape[0] - 1

    x = emby_ref[...]
    h = hprev_ref[...]

    # ---- single-step GRU, one fused MXU pass (PyTorch gate order r, z, n).
    # Zero padding of the embedding axis is self-consistent: padded columns of
    # h_new come out exactly 0.
    xh = jnp.concatenate([x, h], axis=1)                      # (B, 2Ep)
    g = jnp.dot(xh, wg_ref[...], preferred_element_type=jnp.float32) + bg_ref[...]
    r = jax.nn.sigmoid(g[:, 0:Ep])
    z = jax.nn.sigmoid(g[:, Ep:2 * Ep])
    n = jnp.tanh(g[:, 2 * Ep:3 * Ep] + r * g[:, 3 * Ep:4 * Ep])
    h_new = (1.0 - z) * n + z * h
    hout_ref[...] = h_new

    # ---- memory hops (static unroll; hops is small).  Contractions routed
    # through the MXU via batched einsum; mem slabs are re-read from VMEM per
    # hop instead of being carried live across the softmax (shorter ranges).
    need_mask = (m_valid != Mp)
    if need_mask:
        mvalid = lax.broadcasted_iota(jnp.int32, (1, 1, Mp), 2) < m_valid

    q = h_new[:, None, :]            # (B, 1, Ep) f32 accumulator
    o0 = None
    s_last = None
    for hop in range(hops):
        m_k = mem_ref[hop]           # (B, Mp, Ep) bf16
        m_next = mem_ref[hop + 1]    # (B, Mp, Ep) bf16
        # scores: (B,1,Ep) x (B,Mp,Ep) -> (B,1,Mp), f32 accumulation
        s = jnp.einsum('bqe,bme->bqm', q.astype(jnp.bfloat16), m_k,
                       preferred_element_type=jnp.float32)
        s_last = s
        sm = jnp.where(mvalid, s, -1e30) if need_mask else s
        s_max = jnp.max(sm, axis=2, keepdims=True)
        e = jnp.exp(sm - s_max)
        denom = jnp.sum(e, axis=2, keepdims=True)
        attn = e / denom                                      # (B,1,Mp)
        # weighted sum: (B,1,Mp) x (B,Mp,Ep) -> (B,1,Ep)
        o = jnp.einsum('bqm,bme->bqe', attn.astype(jnp.bfloat16), m_next,
                       preferred_element_type=jnp.float32)
        if hop == 0:
            o0 = o
        q = q + o

    # p_ptr = last hop's PRE-softmax scores (matches the PyTorch module).
    pptr_ref[...] = s_last[:, 0, :]
    qo_ref[:, 0:Ep] = h_new.astype(jnp.bfloat16)                # q0
    qo_ref[:, Ep:2 * Ep] = o0[:, 0, :].astype(jnp.bfloat16)     # o0


# ------------------ kernel 2: vocab projection (tiled grid) ----------------- #
def vocab_tile_kernel(qo_ref, wv_ref, bv_ref, out_ref):
    """p_vocab tile: (B, 2Ep) bf16 @ (2Ep, TN) bf16 -> (B, TN) f32 (+ bias)."""
    out_ref[...] = (jnp.dot(qo_ref[...], wv_ref[...],
                            preferred_element_type=jnp.float32) + bv_ref[...])


# -------------------- init-time weight packing (hoisted) -------------------- #
def prepare_decoder_params(w_ih_t, w_hh_t, b_ih, b_hh, w_vocab, b_vocab):
    """Pad / pack all weights ONCE.  Returns (wg, bg, wv, bv, TN).

    w_ih_t, w_hh_t : (E, 3E) f32 (already transposed; gate column blocks r,z,n)
    b_ih, b_hh     : (1, 3E) f32
    w_vocab        : (2E, nwords) f32 ; b_vocab : (1, nwords) f32
    """
    f32, bf16 = jnp.float32, jnp.bfloat16
    E = w_ih_t.shape[0]
    NW = w_vocab.shape[1]
    Ep = _round_up(E, 128)

    def blk(w, g):
        return w[:, g * E:(g + 1) * E]

    # Fused GRU weight (2Ep, 4Ep): [x | h] @ wg, column blocks
    #   [0:Ep)    r combined   (Wih_r ; Whh_r)
    #   [Ep:2Ep)  z combined   (Wih_z ; Whh_z)
    #   [2Ep:3Ep) n input part (Wih_n ; 0)
    #   [3Ep:4Ep) n hidden part(0     ; Whh_n)
    wg = jnp.zeros((2 * Ep, 4 * Ep), f32)
    wg = wg.at[:E, 0:E].set(blk(w_ih_t, 0))
    wg = wg.at[Ep:Ep + E, 0:E].set(blk(w_hh_t, 0))
    wg = wg.at[:E, Ep:Ep + E].set(blk(w_ih_t, 1))
    wg = wg.at[Ep:Ep + E, Ep:Ep + E].set(blk(w_hh_t, 1))
    wg = wg.at[:E, 2 * Ep:2 * Ep + E].set(blk(w_ih_t, 2))
    wg = wg.at[Ep:Ep + E, 3 * Ep:3 * Ep + E].set(blk(w_hh_t, 2))

    bg = jnp.zeros((1, 4 * Ep), f32)
    bg = bg.at[:, 0:E].set(b_ih[:, 0:E] + b_hh[:, 0:E])
    bg = bg.at[:, Ep:Ep + E].set(b_ih[:, E:2 * E] + b_hh[:, E:2 * E])
    bg = bg.at[:, 2 * Ep:2 * Ep + E].set(b_ih[:, 2 * E:3 * E])
    bg = bg.at[:, 3 * Ep:3 * Ep + E].set(b_hh[:, 2 * E:3 * E])

    # Vocab weight: (2E, NW) -> (2Ep, NWp) bf16, q0/o0 row blocks Ep-aligned.
    NWp0 = _round_up(NW, 128)
    TN = _pick_vocab_tile(NWp0)
    NWp = _round_up(NWp0, TN)
    wv = jnp.zeros((2 * Ep, NWp), bf16)
    wv = wv.at[:E, :NW].set(w_vocab[:E].astype(bf16))           # q0 block
    wv = wv.at[Ep:Ep + E, :NW].set(w_vocab[E:].astype(bf16))    # o0 block
    bv = jnp.zeros((1, NWp), f32).at[:, :NW].set(b_vocab)

    return wg, bg, wv, bv, TN


def pad_memories(memories, mp, ep):
    """(hops+1, B, M, E) f32 -> (hops+1, B, Mp, Ep) bf16, zero padded.
    Done once per dialog (after load_memory), NOT per decode step."""
    hp1, B, M, E = memories.shape
    out = jnp.zeros((hp1, B, mp, ep), jnp.bfloat16)
    return out.at[:, :, :M, :E].set(memories.astype(jnp.bfloat16))


# ------------------------------ per-step forward ----------------------------- #
@functools.partial(jax.jit, static_argnames=("m_valid", "e_valid", "nw_valid", "tn"))
def decoder_forward(mem_p, emb_y, h_prev, wg, bg, wv, bv, *,
                    m_valid, e_valid, nw_valid, tn):
    hp1, B, Mp, Ep = mem_p.shape
    assert hp1 >= 2, "Decoder requires hops >= 1 (memories has hops+1 entries)"
    NWp = wv.shape[1]
    f32, bf16 = jnp.float32, jnp.bfloat16

    # Only the tiny per-token tensors are padded per step.
    emb_p = jnp.zeros((B, Ep), f32).at[:, :e_valid].set(emb_y)
    h_p = jnp.zeros((B, Ep), f32).at[:, :e_valid].set(h_prev)

    vmem = pl.BlockSpec(memory_space=pltpu.MemorySpace.VMEM)

    # ---- kernel 1: GRU + memory hops (all-resident, single invocation) ----
    state_bytes = (mem_p.size * 2
                   + (emb_p.size + h_p.size) * 4
                   + (wg.size + bg.size) * 4
                   + B * Mp * 4 + B * Ep * 4 + B * 2 * Ep * 2)

    p_ptr_p, h_out_p, qo = pl.pallas_call(
        functools.partial(decoder_state_kernel, m_valid=m_valid),
        out_shape=(jax.ShapeDtypeStruct((B, Mp), f32),
                   jax.ShapeDtypeStruct((B, Ep), f32),
                   jax.ShapeDtypeStruct((B, 2 * Ep), bf16)),
        in_specs=[vmem] * 5,
        out_specs=(vmem, vmem, vmem),
        compiler_params=pltpu.CompilerParams(
            vmem_limit_bytes=_vmem_limit_bytes(state_bytes)),
    )(mem_p, emb_p, h_p, wg, bg)

    # ---- kernel 2: vocab projection, tiled over nwords, parallel grid ----
    n_tiles = NWp // tn
    vocab_bytes = (B * 2 * Ep * 2            # resident qo
                   + 2 * Ep * tn * 2 * 2     # double-buffered bf16 weight tiles
                   + tn * 4 * 2              # bias tiles
                   + B * tn * 4 * 2)         # output tiles

    p_vocab_p = pl.pallas_call(
        vocab_tile_kernel,
        out_shape=jax.ShapeDtypeStruct((B, NWp), f32),
        grid=(n_tiles,),
        in_specs=[pl.BlockSpec((B, 2 * Ep), lambda j: (0, 0)),   # resident
                  pl.BlockSpec((2 * Ep, tn), lambda j: (0, j)),  # streamed tiles
                  pl.BlockSpec((1, tn), lambda j: (0, j))],
        out_specs=pl.BlockSpec((B, tn), lambda j: (0, j)),
        compiler_params=pltpu.CompilerParams(
            dimension_semantics=("parallel",),
            vmem_limit_bytes=_vmem_limit_bytes(vocab_bytes)),
    )(qo, wv, bv)

    # slice padding back off
    return (p_ptr_p[:, :m_valid], p_vocab_p[:, :nw_valid], h_out_p[:, :e_valid])


# ------------------------ load_memory (plain JAX glue) ---------------------- #
def load_memory(emb_all, context):
    """emb_all: (hops+1, nwords, E); context: (B, M, T) int32 token ids.

    memories[k] = sum_T emb_all[k][context], eval mode (no dropout mask).
    Weight tying C[i] == A[i+1] -> exactly hops+1 distinct embedding matrices.
    """
    mems = []
    for k in range(emb_all.shape[0]):
        e = emb_all[k][context]              # (B, M, T, E) gather
        mems.append(jnp.sum(e, axis=2))      # (B, M, E)
    return jnp.stack(mems, axis=0)           # (hops+1, B, M, E)


# ----------------- pure-JAX reference (same precision policy) --------------- #
def reference_forward(memories, emb_y, h_prev, w_ih_t, w_hh_t, b_ih, b_hh,
                      w_vocab, b_vocab):
    E = emb_y.shape[1]
    hops = memories.shape[0] - 1
    bf = lambda a: a.astype(jnp.bfloat16).astype(jnp.float32)
    mem = bf(memories)
    gi = emb_y @ w_ih_t + b_ih
    gh = h_prev @ w_hh_t + b_hh
    r = jax.nn.sigmoid(gi[:, :E] + gh[:, :E])
    z = jax.nn.sigmoid(gi[:, E:2 * E] + gh[:, E:2 * E])
    n = jnp.tanh(gi[:, 2 * E:] + r * gh[:, 2 * E:])
    h_new = (1.0 - z) * n + z * h_prev
    q0 = h_new
    q = q0
    o0 = None
    p = None
    for hop in range(hops):
        p = jnp.einsum('bme,be->bm', mem[hop], bf(q))
        attn = jax.nn.softmax(p, axis=1)
        o = jnp.einsum('bm,bme->be', bf(attn), mem[hop + 1])
        if hop == 0:
            o0 = o
        q = q + o
    p_vocab = bf(jnp.concatenate([q0, o0], axis=1)) @ bf(w_vocab) + b_vocab
    return p, p_vocab, h_new


# ----------------------------------- main ----------------------------------- #
if __name__ == "__main__":
    key = jax.random.PRNGKey(0)
    B, M, T = 2, 8, 4          # batch, memory slots, tokens per memory slot
    emb_size = 32
    hops = 3
    nwords = 64
    E = emb_size               # mult = 1 (hidden=False)

    ks = jax.random.split(key, 10)

    # Embeddings A/C: N(0, 0.1), padding_idx=0 row zeroed; hops+1 distinct
    # matrices, matrix k feeds memories[k]; C[0] == A[1] == matrix 1.
    emb_all = 0.1 * jax.random.normal(ks[0], (hops + 1, nwords, E), jnp.float32)
    emb_all = emb_all.at[:, 0, :].set(0.0)

    # GRU params (PyTorch layout (3E, E); pre-transposed for the kernel).
    lim = 1.0 / jnp.sqrt(jnp.float32(E))
    w_ih = jax.random.uniform(ks[1], (3 * E, E), jnp.float32, -lim, lim)
    w_hh = jax.random.uniform(ks[2], (3 * E, E), jnp.float32, -lim, lim)
    b_ih = jax.random.uniform(ks[3], (1, 3 * E), jnp.float32, -lim, lim)
    b_hh = jax.random.uniform(ks[4], (1, 3 * E), jnp.float32, -lim, lim)

    # lin_vocab: Linear(2E -> nwords), pre-transposed to (2E, nwords).
    lim_v = 1.0 / jnp.sqrt(jnp.float32(2 * E))
    w_vocab = jax.random.uniform(ks[5], (2 * E, nwords), jnp.float32, -lim_v, lim_v)
    b_vocab = jax.random.uniform(ks[6], (1, nwords), jnp.float32, -lim_v, lim_v)

    # Inputs.
    context = jax.random.randint(ks[7], (B, M, T), 0, nwords, jnp.int32)
    y_prev = jax.random.randint(ks[8], (B,), 0, nwords, jnp.int32)
    h_prev = 0.1 * jax.random.normal(ks[9], (B, E), jnp.float32)

    w_ih_t = w_ih.T                                # (E, 3E)
    w_hh_t = w_hh.T

    # ---- init-time (hoisted out of the decode step): weight packing ----
    wg, bg, wv, bv, TN = prepare_decoder_params(w_ih_t, w_hh_t, b_ih, b_hh,
                                                w_vocab, b_vocab)

    # ---- per-dialog: load_memory + padding of the memory slab ----
    memories = load_memory(emb_all, context)       # (hops+1, B, M, E) f32
    Ep = _round_up(E, 128)
    Mp = _round_up(M, 16)                          # bf16 sublane multiple only
    mem_p = pad_memories(memories, Mp, Ep)         # (hops+1, B, Mp, Ep) bf16

    # ---- per-step: decoder-input embedding (plain JAX gather) + kernels ----
    emb_y = emb_all[1][y_prev]                     # C[0](y_) -> (B, E)

    outs = decoder_forward(mem_p, emb_y, h_prev, wg, bg, wv, bv,
                           m_valid=M, e_valid=E, nw_valid=nwords, tn=TN)
    outs = jax.block_until_ready(outs)

    refs = reference_forward(memories, emb_y, h_prev, w_ih_t, w_hh_t,
                             b_ih, b_hh, w_vocab, b_vocab)
    names = ("p_ptr", "p_vocab", "h")
    # Tolerance accounts for the bf16 memory / attention / vocab streams.
    for name, got, want in zip(names, outs, refs):
        assert got.shape == want.shape, (name, got.shape, want.shape)
        assert jnp.allclose(got, want, atol=2e-3, rtol=2e-3), (
            name, float(jnp.max(jnp.abs(got - want))))

    print("KERNEL_OK")
</pallas_src>

<mosaic_0001>
module attributes {stable_mosaic.version = 11 : i64} {
  func.func @decoder_state_kernel(%arg0: memref<4x2x16x128xbf16, #tpu.memory_space<vmem>>, %arg1: memref<2x128xf32, #tpu.memory_space<vmem>>, %arg2: memref<2x128xf32, #tpu.memory_space<vmem>>, %arg3: memref<256x512xf32, #tpu.memory_space<vmem>>, %arg4: memref<1x512xf32, #tpu.memory_space<vmem>>, %arg5: memref<2x16xf32, #tpu.memory_space<vmem>>, %arg6: memref<2x128xf32, #tpu.memory_space<vmem>>, %arg7: memref<2x256xbf16, #tpu.memory_space<vmem>>) attributes {dimension_semantics = [], scalar_prefetch = 0 : i64, scratch_operands = 0 : i64, tpu.core_type = #tpu.core_type<tc>} {
    %c0 = arith.constant 0 : index
    %c0_0 = arith.constant 0 : index
    %0 = vector.load %arg1[%c0, %c0_0] : memref<2x128xf32, #tpu.memory_space<vmem>>, vector<2x128xf32>
    %c0_1 = arith.constant 0 : index
    %c0_2 = arith.constant 0 : index
    %1 = vector.load %arg2[%c0_1, %c0_2] : memref<2x128xf32, #tpu.memory_space<vmem>>, vector<2x128xf32>
    %2 = tpu.concatenate %0, %1 in 1 : vector<2x128xf32>, vector<2x128xf32> -> vector<2x256xf32>
    %c0_3 = arith.constant 0 : index
    %c0_4 = arith.constant 0 : index
    %3 = vector.load %arg3[%c0_3, %c0_4] : memref<256x512xf32, #tpu.memory_space<vmem>>, vector<256x512xf32>
    %cst = arith.constant dense<0.000000e+00> : vector<2x512xf32>
    %4 = tpu.matmul %2, %3, %cst {dimension_numbers = #tpu.dot_dimension_numbers<[1], [0], [0], [1], [0, 0, 1, 1], [], []>} : vector<2x256xf32>, vector<256x512xf32>, vector<2x512xf32> -> vector<2x512xf32>
    %c0_5 = arith.constant 0 : index
    %c0_6 = arith.constant 0 : index
    %5 = vector.load %arg4[%c0_5, %c0_6] : memref<1x512xf32, #tpu.memory_space<vmem>>, vector<1x512xf32>
    %6 = vector.broadcast %5 : vector<1x512xf32> to vector<2x512xf32>
    %7 = arith.addf %4, %6 : vector<2x512xf32>
    %8 = vector.extract_strided_slice %7 {offsets = [0, 0], sizes = [2, 128], strides = [1, 1]} : vector<2x512xf32> to vector<2x128xf32>
    %9 = arith.negf %8 : vector<2x128xf32>
    %10 = math.exp %9 : vector<2x128xf32>
    %cst_7 = arith.constant 1.000000e+00 : f32
    %11 = vector.broadcast %cst_7 : f32 to vector<2x128xf32>
    %12 = arith.addf %11, %10 : vector<2x128xf32>
    %13 = arith.divf %11, %12 : vector<2x128xf32>
    %14 = vector.extract_strided_slice %7 {offsets = [0, 128], sizes = [2, 128], strides = [1, 1]} : vector<2x512xf32> to vector<2x128xf32>
    %15 = arith.negf %14 : vector<2x128xf32>
    %16 = math.exp %15 : vector<2x128xf32>
    %cst_8 = arith.constant 1.000000e+00 : f32
    %17 = vector.broadcast %cst_8 : f32 to vector<2x128xf32>
    %18 = arith.addf %17, %16 : vector<2x128xf32>
    %19 = arith.divf %17, %18 : vector<2x128xf32>
    %20 = vector.extract_strided_slice %7 {offsets = [0, 256], sizes = [2, 128], strides = [1, 1]} : vector<2x512xf32> to vector<2x128xf32>
    %21 = vector.extract_strided_slice %7 {offsets = [0, 384], sizes = [2, 128], strides = [1, 1]} : vector<2x512xf32> to vector<2x128xf32>
    %22 = arith.mulf %13, %21 : vector<2x128xf32>
    %23 = arith.addf %20, %22 : vector<2x128xf32>
    %24 = math.tanh %23 : vector<2x128xf32>
    %cst_9 = arith.constant 1.000000e+00 : f32
    %25 = vector.broadcast %cst_9 : f32 to vector<2x128xf32>
    %26 = arith.subf %25, %19 : vector<2x128xf32>
    %27 = arith.mulf %26, %24 : vector<2x128xf32>
    %28 = arith.mulf %19, %1 : vector<2x128xf32>
    %29 = arith.addf %27, %28 : vector<2x128xf32>
    %c0_10 = arith.constant 0 : index
    %c0_11 = arith.constant 0 : index
    %30 = vector.load %arg6[%c0_10, %c0_11] : memref<2x128xf32, #tpu.memory_space<vmem>>, vector<2x128xf32>
    tpu.vector_store %arg6[%c0_10, %c0_11], %29 {strides = array<i32>} : memref<2x128xf32, #tpu.memory_space<vmem>>, vector<2x128xf32>,
    %31 = tpu.iota {dimensions = array<i32: 2>} : vector<1x1x16xi32>
    %c8_i32 = arith.constant 8 : i32
    %32 = vector.broadcast %c8_i32 : i32 to vector<1x1x16xi32>
    %33 = arith.cmpi slt, %31, %32 : vector<1x1x16xi32>
    %34 = vector.shape_cast %29 : vector<2x128xf32> to vector<2x1x128xf32>
    %c0_12 = arith.constant 0 : index
    %c0_13 = arith.constant 0 : index
    %c0_14 = arith.constant 0 : index
    %c0_15 = arith.constant 0 : index
    %35 = vector.load %arg0[%c0_12, %c0_13, %c0_14, %c0_15] : memref<4x2x16x128xbf16, #tpu.memory_space<vmem>>, vector<1x2x16x128xbf16>
    %36 = vector.shape_cast %35 : vector<1x2x16x128xbf16> to vector<2x16x128xbf16>
    %c1 = arith.constant 1 : index
    %c0_16 = arith.constant 0 : index
    %c0_17 = arith.constant 0 : index
    %c0_18 = arith.constant 0 : index
    %37 = vector.load %arg0[%c1, %c0_16, %c0_17, %c0_18] : memref<4x2x16x128xbf16, #tpu.memory_space<vmem>>, vector<1x2x16x128xbf16>
    %38 = vector.shape_cast %37 : vector<1x2x16x128xbf16> to vector<2x16x128xbf16>
    %39 = arith.truncf %34 : vector<2x1x128xf32> to vector<2x1x128xbf16>
    "tpu.trace_start"() <{level = 10 : i32, message = "bqe,bme->bqm"}> : () -> ()
    %cst_19 = arith.constant dense<0.000000e+00> : vector<2x1x16xf32>
    %40 = tpu.matmul %39, %36, %cst_19 {dimension_numbers = #tpu.dot_dimension_numbers<[2], [2], [1], [1], [0, 0, 0, 1, 1, 1], [0], [0]>} : vector<2x1x128xbf16>, vector<2x16x128xbf16>, vector<2x1x16xf32> -> vector<2x1x16xf32>
    %cst_20 = arith.constant -1.000000e+30 : f32
    "tpu.trace_stop"() : () -> ()
    %41 = vector.shape_cast %33 : vector<1x1x16xi1> to vector<1x1x16xi1>
    %42 = vector.broadcast %41 : vector<1x1x16xi1> to vector<2x1x16xi1>
    %43 = vector.broadcast %cst_20 : f32 to vector<2x1x16xf32>
    %44 = arith.select %42, %40, %43 : vector<2x1x16xi1>, vector<2x1x16xf32>
    %cst_21 = arith.constant dense<0xFF800000> : vector<2x1xf32>
    %45 = vector.multi_reduction <maximumf>, %44, %cst_21 [2] : vector<2x1x16xf32> to vector<2x1xf32>
    %46 = vector.shape_cast %45 : vector<2x1xf32> to vector<2x1x1xf32>
    %47 = vector.broadcast %46 : vector<2x1x1xf32> to vector<2x1x16xf32>
    %48 = arith.subf %44, %47 : vector<2x1x16xf32>
    %49 = math.exp %48 : vector<2x1x16xf32>
    %cst_22 = arith.constant dense<0.000000e+00> : vector<2x1xf32>
    %50 = vector.multi_reduction <add>, %49, %cst_22 [2] : vector<2x1x16xf32> to vector<2x1xf32>
    %51 = vector.shape_cast %50 : vector<2x1xf32> to vector<2x1x1xf32>
    %52 = vector.broadcast %51 : vector<2x1x1xf32> to vector<2x1x16xf32>
    %53 = arith.divf %49, %52 : vector<2x1x16xf32>
    %54 = arith.truncf %53 : vector<2x1x16xf32> to vector<2x1x16xbf16>
    "tpu.trace_start"() <{level = 10 : i32, message = "bqm,bme->bqe"}> : () -> ()
    %cst_23 = arith.constant dense<0.000000e+00> : vector<2x1x128xf32>
    %55 = tpu.matmul %54, %38, %cst_23 {dimension_numbers = #tpu.dot_dimension_numbers<[2], [1], [1], [2], [0, 0, 0, 1, 1, 2], [0], [0]>} : vector<2x1x16xbf16>, vector<2x16x128xbf16>, vector<2x1x128xf32> -> vector<2x1x128xf32>
    "tpu.trace_stop"() : () -> ()
    %56 = arith.addf %34, %55 : vector<2x1x128xf32>
    %c1_24 = arith.constant 1 : index
    %c0_25 = arith.constant 0 : index
    %c0_26 = arith.constant 0 : index
    %c0_27 = arith.constant 0 : index
    %57 = vector.load %arg0[%c1_24, %c0_25, %c0_26, %c0_27] : memref<4x2x16x128xbf16, #tpu.memory_space<vmem>>, vector<1x2x16x128xbf16>
    %58 = vector.shape_cast %57 : vector<1x2x16x128xbf16> to vector<2x16x128xbf16>
    %c2 = arith.constant 2 : index
    %c0_28 = arith.constant 0 : index
    %c0_29 = arith.constant 0 : index
    %c0_30 = arith.constant 0 : index
    %59 = vector.load %arg0[%c2, %c0_28, %c0_29, %c0_30] : memref<4x2x16x128xbf16, #tpu.memory_space<vmem>>, vector<1x2x16x128xbf16>
    %60 = vector.shape_cast %59 : vector<1x2x16x128xbf16> to vector<2x16x128xbf16>
    %61 = arith.truncf %56 : vector<2x1x128xf32> to vector<2x1x128xbf16>
    "tpu.trace_start"() <{level = 10 : i32, message = "bqe,bme->bqm"}> : () -> ()
    %cst_31 = arith.constant dense<0.000000e+00> : vector<2x1x16xf32>
    %62 = tpu.matmul %61, %58, %cst_31 {dimension_numbers = #tpu.dot_dimension_numbers<[2], [2], [1], [1], [0, 0, 0, 1, 1, 1], [0], [0]>} : vector<2x1x128xbf16>, vector<2x16x128xbf16>, vector<2x1x16xf32> -> vector<2x1x16xf32>
    %cst_32 = arith.constant -1.000000e+30 : f32
    "tpu.trace_stop"() : () -> ()
    %63 = vector.shape_cast %33 : vector<1x1x16xi1> to vector<1x1x16xi1>
    %64 = vector.broadcast %63 : vector<1x1x16xi1> to vector<2x1x16xi1>
    %65 = vector.broadcast %cst_32 : f32 to vector<2x1x16xf32>
    %66 = arith.select %64, %62, %65 : vector<2x1x16xi1>, vector<2x1x16xf32>
    %cst_33 = arith.constant dense<0xFF800000> : vector<2x1xf32>
    %67 = vector.multi_reduction <maximumf>, %66, %cst_33 [2] : vector<2x1x16xf32> to vector<2x1xf32>
    %68 = vector.shape_cast %67 : vector<2x1xf32> to vector<2x1x1xf32>
    %69 = vector.broadcast %68 : vector<2x1x1xf32> to vector<2x1x16xf32>
    %70 = arith.subf %66, %69 : vector<2x1x16xf32>
    %71 = math.exp %70 : vector<2x1x16xf32>
    %cst_34 = arith.constant dense<0.000000e+00> : vector<2x1xf32>
    %72 = vector.multi_reduction <add>, %71, %cst_34 [2] : vector<2x1x16xf32> to vector<2x1xf32>
    %73 = vector.shape_cast %72 : vector<2x1xf32> to vector<2x1x1xf32>
    %74 = vector.broadcast %73 : vector<2x1x1xf32> to vector<2x1x16xf32>
    %75 = arith.divf %71, %74 : vector<2x1x16xf32>
    %76 = arith.truncf %75 : vector<2x1x16xf32> to vector<2x1x16xbf16>
    "tpu.trace_start"() <{level = 10 : i32, message = "bqm,bme->bqe"}> : () -> ()
    %cst_35 = arith.constant dense<0.000000e+00> : vector<2x1x128xf32>
    %77 = tpu.matmul %76, %60, %cst_35 {dimension_numbers = #tpu.dot_dimension_numbers<[2], [1], [1], [2], [0, 0, 0, 1, 1, 2], [0], [0]>} : vector<2x1x16xbf16>, vector<2x16x128xbf16>, vector<2x1x128xf32> -> vector<2x1x128xf32>
    "tpu.trace_stop"() : () -> ()
    %78 = arith.addf %56, %77 : vector<2x1x128xf32>
    %c2_36 = arith.constant 2 : index
    %c0_37 = arith.constant 0 : index
    %c0_38 = arith.constant 0 : index
    %c0_39 = arith.constant 0 : index
    %79 = vector.load %arg0[%c2_36, %c0_37, %c0_38, %c0_39] : memref<4x2x16x128xbf16, #tpu.memory_space<vmem>>, vector<1x2x16x128xbf16>
    %80 = vector.shape_cast %79 : vector<1x2x16x128xbf16> to vector<2x16x128xbf16>
    %81 = arith.truncf %78 : vector<2x1x128xf32> to vector<2x1x128xbf16>
    "tpu.trace_start"() <{level = 10 : i32, message = "bqe,bme->bqm"}> : () -> ()
    %cst_40 = arith.constant dense<0.000000e+00> : vector<2x1x16xf32>
    %82 = tpu.matmul %81, %80, %cst_40 {dimension_numbers = #tpu.dot_dimension_numbers<[2], [2], [1], [1], [0, 0, 0, 1, 1, 1], [0], [0]>} : vector<2x1x128xbf16>, vector<2x16x128xbf16>, vector<2x1x16xf32> -> vector<2x1x16xf32>
    "tpu.trace_stop"() : () -> ()
    %83 = vector.shape_cast %82 : vector<2x1x16xf32> to vector<2x16xf32>
    %c0_41 = arith.constant 0 : index
    %c0_42 = arith.constant 0 : index
    %84 = vector.load %arg5[%c0_41, %c0_42] : memref<2x16xf32, #tpu.memory_space<vmem>>, vector<2x16xf32>
    tpu.vector_store %arg5[%c0_41, %c0_42], %83 {strides = array<i32>} : memref<2x16xf32, #tpu.memory_space<vmem>>, vector<2x16xf32>,
    %85 = arith.truncf %29 : vector<2x128xf32> to vector<2x128xbf16>
    %c0_43 = arith.constant 0 : index
    %c0_44 = arith.constant 0 : index
    %86 = vector.load %arg7[%c0_43, %c0_44] : memref<2x256xbf16, #tpu.memory_space<vmem>>, vector<2x128xbf16>
    tpu.vector_store %arg7[%c0_43, %c0_44], %85 {strides = array<i32>} : memref<2x256xbf16, #tpu.memory_space<vmem>>, vector<2x128xbf16>,
    %87 = vector.shape_cast %55 : vector<2x1x128xf32> to vector<2x128xf32>
    %88 = arith.truncf %87 : vector<2x128xf32> to vector<2x128xbf16>
    %c0_45 = arith.constant 0 : index
    %c128 = arith.constant 128 : index
    %89 = vector.load %arg7[%c0_45, %c128] : memref<2x256xbf16, #tpu.memory_space<vmem>>, vector<2x128xbf16>
    tpu.vector_store %arg7[%c0_45, %c128], %88 {strides = array<i32>} : memref<2x256xbf16, #tpu.memory_space<vmem>>, vector<2x128xbf16>,
    return
  }
}

module attributes {stable_mosaic.version = 11 : i64} {
  func.func @vocab_tile_kernel(%arg0: i32, %arg1: memref<2x256xbf16, #tpu.memory_space<vmem>>, %arg2: memref<256x128xbf16, #tpu.memory_space<vmem>>, %arg3: memref<1x128xf32, #tpu.memory_space<vmem>>, %arg4: memref<2x128xf32, #tpu.memory_space<vmem>>) attributes {dimension_semantics = [#tpu.dimension_semantics<parallel>], iteration_bounds = array<i64: 1>, scalar_prefetch = 0 : i64, scratch_operands = 0 : i64, tpu.core_type = #tpu.core_type<tc>, window_params = [{pipeline_mode = #tpu.pipeline_mode<synchronous>, transform_indices = @transform_0, window_bounds = array<i64: 2, 256>}, {transform_indices = @transform_1, window_bounds = array<i64: 256, 128>}, {transform_indices = @transform_2, window_bounds = array<i64: 1, 128>}, {transform_indices = @transform_3, window_bounds = array<i64: 2, 128>}]} {
    %c0 = arith.constant 0 : index
    %c0_0 = arith.constant 0 : index
    %0 = vector.load %arg1[%c0, %c0_0] : memref<2x256xbf16, #tpu.memory_space<vmem>>, vector<2x256xbf16>
    %c0_1 = arith.constant 0 : index
    %c0_2 = arith.constant 0 : index
    %1 = vector.load %arg2[%c0_1, %c0_2] : memref<256x128xbf16, #tpu.memory_space<vmem>>, vector<256x128xbf16>
    %cst = arith.constant dense<0.000000e+00> : vector<2x128xf32>
    %2 = tpu.matmul %0, %1, %cst {dimension_numbers = #tpu.dot_dimension_numbers<[1], [0], [0], [1], [0, 0, 1, 1], [], []>} : vector<2x256xbf16>, vector<256x128xbf16>, vector<2x128xf32> -> vector<2x128xf32>
    %c0_3 = arith.constant 0 : index
    %c0_4 = arith.constant 0 : index
    %3 = vector.load %arg3[%c0_3, %c0_4] : memref<1x128xf32, #tpu.memory_space<vmem>>, vector<1x128xf32>
    %4 = vector.broadcast %3 : vector<1x128xf32> to vector<2x128xf32>
    %5 = arith.addf %2, %4 : vector<2x128xf32>
    %c0_5 = arith.constant 0 : index
    %c0_6 = arith.constant 0 : index
    %6 = vector.load %arg4[%c0_5, %c0_6] : memref<2x128xf32, #tpu.memory_space<vmem>>, vector<2x128xf32>
    tpu.vector_store %arg4[%c0_5, %c0_6], %5 {strides = array<i32>} : memref<2x128xf32, #tpu.memory_space<vmem>>, vector<2x128xf32>,
    return
  }
  func.func @transform_0(%arg0: i32) -> (i32, i32) {
    %c0_i32 = arith.constant 0 : i32
    %c0_i32_0 = arith.constant 0 : i32
    %c0_i32_1 = arith.constant 0 : i32
    return %c0_i32, %c0_i32_0 : i32, i32
  }
  func.func @transform_1(%arg0: i32) -> (i32, i32) {
    %c0_i32 = arith.constant 0 : i32
    %c0_i32_0 = arith.constant 0 : i32
    return %c0_i32, %arg0 : i32, i32
  }
  func.func @transform_2(%arg0: i32) -> (i32, i32) {
    %c0_i32 = arith.constant 0 : i32
    %c0_i32_0 = arith.constant 0 : i32
    return %c0_i32, %arg0 : i32, i32
  }
  func.func @transform_3(%arg0: i32) -> (i32, i32) {
    %c0_i32 = arith.constant 0 : i32
    %c0_i32_0 = arith.constant 0 : i32
    return %c0_i32, %arg0 : i32, i32
  }
}

</mosaic_0001>

<bundles_post_ra>
// kernel: decoder_forward.3
= control target key start
LH: loop header
LB: loop body
LE: loop exit
PB: predicated region body
PF: predicated region fallthrough
CT: control target
= control target key end

     0   :  { %v68_v9 = vlaneseq  ;;  %v314_v13 = vmov 1966171168   ;;  %s402_s0 = inlined_call_operand.vmem [shape: bf16[2,256], index: 0, kind: input, shape index: {}]   ;;  %s403_s1 = inlined_call_operand.vmem [shape: bf16[256,128], index: 1, kind: input, shape index: {}]   ;;  %s404_s2 = inlined_call_operand.vmem [shape: f32[1,128], index: 2, kind: input, shape index: {}]   ;;  %s405_s3 = inlined_call_operand.hbm [shape: f32[2,128], index: 3, kind: output, shape index: {}]  }
   0x1   :  { %v274_v0 = vld [vmem:[%s403_s1 + $0x40] sm:$0xff]   ;;  %v276_v2 = vld [vmem:[%s403_s1 + $0x48] sm:$0xff]   ;;  %v278_v4 = vld [vmem:[%s403_s1 + $0x50] sm:$0xff]   ;;  %v66_v14 = vunpack.c.l.s4 %v314_v13 }
   0x2   :  { %v275_v1 = vld [vmem:[%s403_s1] sm:$0xff]   ;;  %250 = vmatprep.subr.bf16.mxu0 %v274_v0  ;;  %v277_v3 = vld [vmem:[%s403_s1 + $0x8] sm:$0xff]   ;;  %v279_v5 = vld [vmem:[%s403_s1 + $0x10] sm:$0xff]   ;;  %v69_v15 = vshrl.u32 %v68_v9, 7 }
   0x3   :  { %251 = vmatpush3.bf16.msra.mxu0 %v275_v1  ;;  %v280_v6 = vld [vmem:[%s403_s1 + $0x58] sm:$0xff]   ;;  %v282_v8 = vld [vmem:[%s403_s1 + $0x60] sm:$0xff]   ;;  %v284_v11 = vld [vmem:[%s403_s1 + $0x68] sm:$0xff]  }
   0x4   :  { %252 = vmatprep.subr.bf16.mxu0 %v276_v2  ;;  %v281_v7 = vld [vmem:[%s403_s1 + $0x18] sm:$0xff]   ;;  %v283_v10 = vld [vmem:[%s403_s1 + $0x20] sm:$0xff]  }
   0x5   :  { %v233_v12 = vld.sshfl [vmem:[%s402_s0] sm:$0x11 pattern:$0x75316420] }
   0x7   :  { %253 = vmatpush3.bf16.msra.mxu0 %v277_v3 }
   0x8   :  { %254 = vmatprep.subr.bf16.mxu0 %v278_v4 }
   0xb   :  { %255 = vmatpush3.bf16.msra.mxu0 %v279_v5 }
   0xc   :  { %256 = vmatprep.subr.bf16.mxu0 %v280_v6 }
   0xf   :  { %257 = vmatpush3.bf16.msra.mxu0 %v281_v7 }
  0x10   :  { %258 = vmatprep.subr.bf16.mxu0 %v282_v8 }
  0x11   :  { %8 = vsyncpa [#allocation3], 0  ;;  %v285_v16 = vld [vmem:[%s403_s1 + $0x28] sm:$0xff]   ;;  %v64_v17 = vcombine.high %v233_v12, %v233_v12  ;;  %v67_v18 = vunpack.c.0.s8 %v66_v14  ;;  %v286_v19 = vld [vmem:[%s403_s1 + $0x70] sm:$0xff]   ;;  %s315_s20 = smov [#allocation2]  }
  0x12   :  { %v287_v21 = vld [vmem:[%s403_s1 + $0x30] sm:$0xff]   ;;  %v288_v23 = vld [vmem:[%s403_s1 + $0x78] sm:$0xff]   ;;  %v232_v28 = vld [vmem:[%s404_s2] ss:$0 sm:$0xff]  ;;  %s224_s21 = sshll.u32 %s315_s20, 4  ;;  %s225_s21 = int_to_ptr.vmem [resolvable:$true] %s224_s21 }
  0x13   :  { %259 = vmatpush3.bf16.msra.mxu0 %v283_v10  ;;  %v70_v20 = vsub.s32 %v67_v18, %v69_v15  ;;  %v289_v24 = vld [vmem:[%s403_s1 + $0x38] sm:$0xff]   ;;  %s290_s22 = scalar_lea.vmem %s225_s21, 32  ;;  %p295_p1 = scmp.lt.s32.totalorder %s225_s21, %s225_s21 }
  0x14   :  { %260 = vmatprep.subr.bf16.mxu0 %v284_v11  ;;  %p291_p0 = scmp.ne.s32.totalorder %s225_s21, %s290_s22  ;;  %p296_p2 = scmp.lt.s32.totalorder %s290_s22, %s290_s22 }
  0x15   :  { %v78_v22 = vrot.slane %v64_v17, %v70_v20  ;;  %v71_v25 = vrot.slane %v233_v12, %v70_v20 }
  0x16   :  { %p297_p3 = por %p296_p2, %p295_p1 }
  0x17   :  { %261 = vmatpush3.bf16.msra.mxu0 %v285_v16  ;;  %209 = vmatprep.mubr.bf16.mxu0 %v78_v22 }
  0x18   :  { %262 = vmatprep.subr.bf16.mxu0 %v286_v19  ;;  %p298_p4 = pnand %p297_p3, %p291_p0 }
  0x1b   :  { %263 = vmatpush3.bf16.msra.mxu0 %v287_v21 }
  0x1c   :  { %264 = vmatprep.subr.bf16.mxu0 %v288_v23 }
  0x1f   :  { %265 = vmatpush3.bf16.msra.mxu0 %v289_v24 }
  0x22   :  { %210 = vmatmul.mubr.bf16.vlgmr.msra.gmra.mrb[0].mxu0 %v71_v25 }
  0xf5   :  { %v266_v26 = vpop.f32.mrb[0].mxu0 }
  0xf6   :  { %v267_v27 = vpop.f32.mrb[1].mxu0 }
  0xf7   :  { %v268_v29 = vadd.f32 %v267_v27, %v266_v26  ;;  %v269_v30 = vpop.f32.mrb[2].mxu0 }
  0xf8   :  { %v270_v31 = vpop.f32.mrb[3].mxu0 }
  0xf9   :  { %v212_v32 = vadd.f32 %v268_v29, %v232_v28 }
  0xfb   :  { %217 = vst [vmem:[#allocation2] sm:$0x3] %v212_v32 }
  0xfc   :  { %301 = shalt.err (!%p298_p4)
}
  0xfd   :  { %s302_s24 = scalar_lea.hbm %s405_s3, 32 }
  0xfe   :  { %p303_p5 = scmp.ne.s32.totalorder %s405_s3, %s302_s24  ;;  %p306_p6 = scmp.lt.u32.totalorder %s302_s24, %s405_s3 }
 0x100   :  { %p308_p7 = pnand %p306_p6, %p303_p5 }
 0x102   :  { %311 = shalt.err (!%p308_p7)
}
 0x103   :  { %227 = dma.vmem_to_hbm [thread:$0]  %s225_s21, 32, %s405_s3, [#allocation3]  }
 0x104   :  { %312 = dma.done.wait [#allocation3], 32  }
 0x105   :  { %313 = vsyncadd [#allocation3], 4294967264 }
 0x106   :  { %231 = vsyncpa [#allocation3], 1 }

// kernel: decoder_forward.2
= control target key start
LH: loop header
LB: loop body
LE: loop exit
PB: predicated region body
PF: predicated region fallthrough
CT: control target
= control target key end

     0   :  { %13 = vsyncpa [#allocation3], 0  ;;  %s1663_s0 = inlined_call_operand.hbm [shape: bf16[4,2,16,128], index: 0, kind: input, shape index: {}]   ;;  %s1664_s1 = inlined_call_operand.vmem [shape: f32[2,128], index: 1, kind: input, shape index: {}]   ;;  %s1665_s2 = inlined_call_operand.vmem [shape: f32[2,128], index: 2, kind: input, shape index: {}]   ;;  %s1666_s3 = inlined_call_operand.hbm [shape: f32[256,512], index: 3, kind: input, shape index: {}]   ;;  %s1667_s4 = inlined_call_operand.vmem [shape: f32[1,512], index: 4, kind: input, shape index: {}]   ;;  %s1668_s5 = inlined_call_operand.hbm [shape: f32[2,16], index: 5, kind: output, shape index: {0}]   ;;  %s1669_s6 = inlined_call_operand.hbm [shape: f32[2,128], index: 6, kind: output, shape index: {1}]   ;;  %s1670_s7 = inlined_call_operand.vmem [shape: bf16[2,256], index: 7, kind: output, shape index: {2}]  }
   0x1   :  { %14 = vsyncpa [#allocation6], 0 }
   0x2   :  { %15 = vsyncpa [#allocation4], 0 }
   0x3   :  { %16 = vsyncpa [#allocation9], 0  ;;  %s1450_s24 = smov [#allocation2]   ;;  %s1354_s28 = scalar_lea.hbm %s1663_s0, 1024 }
   0x4   :  { %s22_s25 = sshll.u32 %s1450_s24, 4  ;;  %p1355_p0 = scmp.ne.s32.totalorder %s1663_s0, %s1354_s28  ;;  %s23_s25 = int_to_ptr.vmem [resolvable:$true] %s22_s25 }
   0x5   :  { %p1358_p1 = scmp.lt.u32.totalorder %s1354_s28, %s1663_s0 }
   0x7   :  { %p1360_p2 = pnand %p1358_p1, %p1355_p0 }
   0x9   :  { %1363 = shalt.err (!%p1360_p2)
}
   0xa   :  { %s1364_s10 = scalar_lea.vmem %s23_s25, 1024  ;;  %p1369_p4 = scmp.lt.s32.totalorder %s23_s25, %s23_s25 }
   0xb   :  { %p1365_p3 = scmp.ne.s32.totalorder %s23_s25, %s1364_s10  ;;  %p1370_p5 = scmp.lt.s32.totalorder %s1364_s10, %s1364_s10 }
   0xd   :  { %p1371_p6 = por %p1370_p5, %p1369_p4 }
   0xf   :  { %p1372_p7 = pnand %p1371_p6, %p1365_p3 }
  0x11   :  { %1375 = shalt.err (!%p1372_p7)
}
  0x12   :  { %s1451_s11 = smov 64   ;;  %s1452_s12 = smov 4  }
  0x13   :  { %28 = dma.hbm_to_vmem [thread:$0]  %s1663_s0, 1024, %s23_s25, [#allocation3], %s1451_s11, %s1451_s11, %s1452_s12  }
  0x14   :  { %s1453_s15 = smov [#allocation5]   ;;  %s1376_s19 = scalar_lea.hbm %s1666_s3, 16384 }
  0x15   :  { %s38_s16 = sshll.u32 %s1453_s15, 4  ;;  %p1377_p8 = scmp.ne.s32.totalorder %s1666_s3, %s1376_s19  ;;  %s39_s16 = int_to_ptr.vmem [resolvable:$true] %s38_s16 }
  0x16   :  { %p1380_p9 = scmp.lt.u32.totalorder %s1376_s19, %s1666_s3 }
  0x18   :  { %p1382_p10 = pnand %p1380_p9, %p1377_p8 }
  0x1a   :  { %1385 = shalt.err (!%p1382_p10)
}
  0x1b   :  { %s1386_s24 = scalar_lea.vmem %s39_s16, 16384  ;;  %p1391_p12 = scmp.lt.s32.totalorder %s39_s16, %s39_s16 }
  0x1c   :  { %p1387_p11 = scmp.ne.s32.totalorder %s39_s16, %s1386_s24  ;;  %p1392_p13 = scmp.lt.s32.totalorder %s1386_s24, %s1386_s24 }
  0x1e   :  { %p1393_p0 = por %p1392_p13, %p1391_p12 }
  0x20   :  { %p1394_p1 = pnand %p1393_p0, %p1387_p11 }
  0x22   :  { %1397 = shalt.err (!%p1394_p1)
}
  0x23   :  { %s1454_s0 = smov 512   ;;  %s1455_s25 = smov 32  }
  0x24   :  { %44 = dma.hbm_to_vmem [thread:$0]  %s1666_s3, 16384, %s39_s16, [#allocation6], %s1454_s0, %s1454_s0, %s1455_s25  }
  0x25   :  { %1442 = dma.done.wait [#allocation3], 1024  }
  0x26   :  { %1443 = vsyncadd [#allocation3], 4294966272 }
  0x27   :  { %1444 = dma.done.wait [#allocation6], 16384  }
  0x28   :  { %1445 = vsyncadd [#allocation6], 4294950912  ;;  %v57_v0 = vld [vmem:[#allocation5 + $0x8] sm:$0xff]  ;;  %v56_v2 = vld [vmem:[#allocation5] sm:$0xff]  ;;  %vm1457_vm0 = vmmov 0   ;;  %vm503_vm2 = vcmask 122880  }
  0x29   :  { %v61_v1 = vld [vmem:[#allocation5 + $0x28] sm:$0xff]  ;;  %v60_v4 = vld [vmem:[#allocation5 + $0x20] sm:$0xff]  ;;  %v59_v21 = vld [vmem:[#allocation5 + $0x18] sm:$0xff]  ;;  %vm534_vm3 = vcmask 130048   ;;  %vm959_vm4 = vcmask 1041409  }
  0x2a   :  { %v1178_v3 = vpack.c.bf16 %v61_v1, %v57_v0  ;;  %v65_v5 = vld [vmem:[#allocation5 + $0x48] sm:$0xff]  ;;  %v1180_v7 = vpack.c.bf16 %v60_v4, %v56_v2  ;;  %v64_v9 = vld [vmem:[#allocation5 + $0x40] sm:$0xff]  ;;  %v63_v25 = vld [vmem:[#allocation5 + $0x38] sm:$0xff] }
  0x2b   :  { %v69_v6 = vld [vmem:[#allocation5 + $0x68] sm:$0xff]  ;;  %v68_v10 = vld [vmem:[#allocation5 + $0x60] sm:$0xff]  ;;  %v1242_v27 = vpack.c.bf16 %v63_v25, %v59_v21  ;;  %v58_v28 = vld [vmem:[#allocation5 + $0x10] sm:$0xff] }
  0x2c   :  { %v1182_v8 = vpack.c.bf16 %v69_v6, %v65_v5  ;;  %v73_v11 = vld [vmem:[#allocation5 + $0x88] sm:$0xff]  ;;  %1179 = vmatprep.subr.bf16.mxu0 %v1178_v3  ;;  %v1184_v13 = vpack.c.bf16 %v68_v10, %v64_v9  ;;  %v72_v15 = vld [vmem:[#allocation5 + $0x80] sm:$0xff]  ;;  %v62_v29 = vld [vmem:[#allocation5 + $0x30] sm:$0xff] }
  0x2d   :  { %v77_v12 = vld [vmem:[#allocation5 + $0xa8] sm:$0xff]  ;;  %1181 = vmatpush1.bf16.msra.mxu0 %v1180_v7  ;;  %v76_v16 = vld [vmem:[#allocation5 + $0xa0] sm:$0xff]  ;;  %v1244_v30 = vpack.c.bf16 %v62_v29, %v58_v28  ;;  %v67_v31 = vld [vmem:[#allocation5 + $0x58] sm:$0xff]  ;;  %1243 = vmatprep.subr.bf16.mxu1 %v1242_v27 }
  0x2e   :  { %1183 = vmatprep.subr.bf16.mxu0 %v1182_v8  ;;  %v1186_v14 = vpack.c.bf16 %v77_v12, %v73_v11  ;;  %v81_v17 = vld [vmem:[#allocation5 + $0xc8] sm:$0xff]  ;;  %v1188_v19 = vpack.c.bf16 %v76_v16, %v72_v15  ;;  %v80_v20 = vld [vmem:[#allocation5 + $0xc0] sm:$0xff]  ;;  %v71_v32 = vld [vmem:[#allocation5 + $0x78] sm:$0xff] }
  0x2f   :  { %v85_v18 = vld [vmem:[#allocation5 + $0xe8] sm:$0xff]  ;;  %v84_v23 = vld [vmem:[#allocation5 + $0xe0] sm:$0xff]  ;;  %v1246_v35 = vpack.c.bf16 %v71_v32, %v67_v31  ;;  %v66_v36 = vld [vmem:[#allocation5 + $0x50] sm:$0xff]  ;;  %1245 = vmatpush1.bf16.msra.mxu1 %v1244_v30 }
  0x30   :  { %v1190_v22 = vpack.c.bf16 %v85_v18, %v81_v17  ;;  %v89_v24 = vld [vmem:[#allocation5 + $0x108] sm:$0xff]  ;;  %v1192_v33 = vpack.c.bf16 %v84_v23, %v80_v20  ;;  %v88_v34 = vld [vmem:[#allocation5 + $0x100] sm:$0xff]  ;;  %v70_v40 = vld [vmem:[#allocation5 + $0x70] sm:$0xff] }
  0x31   :  { %1185 = vmatpush1.bf16.msra.mxu0 %v1184_v13  ;;  %v93_v26 = vld [vmem:[#allocation5 + $0x128] sm:$0xff]  ;;  %v92_v38 = vld [vmem:[#allocation5 + $0x120] sm:$0xff]  ;;  %1247 = vmatprep.subr.bf16.mxu1 %v1246_v35  ;;  %v1248_v42 = vpack.c.bf16 %v70_v40, %v66_v36  ;;  %v75_v43 = vld [vmem:[#allocation5 + $0x98] sm:$0xff] }
  0x32   :  { %1187 = vmatprep.subr.bf16.mxu0 %v1186_v14  ;;  %v1194_v37 = vpack.c.bf16 %v93_v26, %v89_v24  ;;  %v97_v39 = vld [vmem:[#allocation5 + $0x148] sm:$0xff]  ;;  %v79_v44 = vld [vmem:[#allocation5 + $0xb8] sm:$0xff]  ;;  %v74_v46 = vld [vmem:[#allocation5 + $0x90] sm:$0xff]  ;;  %v1196_v48 = vpack.c.bf16 %v92_v38, %v88_v34 }
  0x33   :  { %v101_v41 = vld [vmem:[#allocation5 + $0x168] sm:$0xff]  ;;  %v1250_v45 = vpack.c.bf16 %v79_v44, %v75_v43  ;;  %v78_v47 = vld [vmem:[#allocation5 + $0xb0] sm:$0xff]  ;;  %v96_v49 = vld [vmem:[#allocation5 + $0x140] sm:$0xff]  ;;  %1249 = vmatpush1.bf16.msra.mxu1 %v1248_v42 }
  0x34   :  { %v83_v50 = vld [vmem:[#allocation5 + $0xd8] sm:$0xff]  ;;  %v1198_v51 = vpack.c.bf16 %v101_v41, %v97_v39  ;;  %v100_v52 = vld [vmem:[#allocation5 + $0x160] sm:$0xff]  ;;  %v105_v53 = vld [vmem:[#allocation5 + $0x188] sm:$0xff]  ;;  %v1252_v54 = vpack.c.bf16 %v78_v47, %v74_v46 }
  0x35   :  { %1189 = vmatpush1.bf16.msra.mxu0 %v1188_v19  ;;  %v87_v55 = vld [vmem:[#allocation5 + $0xf8] sm:$0xff]  ;;  %v109_v56 = vld [vmem:[#allocation5 + $0x1a8] sm:$0xff]  ;;  %1251 = vmatprep.subr.bf16.mxu1 %v1250_v45  ;;  %v82_v58 = vld [vmem:[#allocation5 + $0xd0] sm:$0xff]  ;;  %v1200_v62 = vpack.c.bf16 %v100_v52, %v96_v49 }
  0x36   :  { %1191 = vmatprep.subr.bf16.mxu0 %v1190_v22  ;;  %v1254_v57 = vpack.c.bf16 %v87_v55, %v83_v50  ;;  %v86_v59 = vld [vmem:[#allocation5 + $0xf0] sm:$0xff]  ;;  %v91_v60 = vld [vmem:[#allocation5 + $0x118] sm:$0xff]  ;;  %v1202_v63 = vpack.c.bf16 %v109_v56, %v105_v53  ;;  %v104_v0 = vld [vmem:[#allocation5 + $0x180] sm:$0xff] }
  0x37   :  { %v95_v61 = vld [vmem:[#allocation5 + $0x138] sm:$0xff]  ;;  %v108_v1 = vld [vmem:[#allocation5 + $0x1a0] sm:$0xff]  ;;  %v113_v2 = vld [vmem:[#allocation5 + $0x1c8] sm:$0xff]  ;;  %1253 = vmatpush1.bf16.msra.mxu1 %v1252_v54  ;;  %v1256_v3 = vpack.c.bf16 %v86_v59, %v82_v58 }
  0x38   :  { %v117_v4 = vld [vmem:[#allocation5 + $0x1e8] sm:$0xff]  ;;  %1255 = vmatprep.subr.bf16.mxu1 %v1254_v57  ;;  %v1258_v5 = vpack.c.bf16 %v95_v61, %v91_v60  ;;  %v90_v6 = vld [vmem:[#allocation5 + $0x110] sm:$0xff]  ;;  %v99_v8 = vld [vmem:[#allocation5 + $0x158] sm:$0xff]  ;;  %v1204_v10 = vpack.c.bf16 %v108_v1, %v104_v0 }
  0x39   :  { %1193 = vmatpush1.bf16.msra.mxu0 %v1192_v33  ;;  %v94_v7 = vld [vmem:[#allocation5 + $0x130] sm:$0xff]  ;;  %v103_v9 = vld [vmem:[#allocation5 + $0x178] sm:$0xff]  ;;  %v1206_v11 = vpack.c.bf16 %v117_v4, %v113_v2  ;;  %v112_v12 = vld [vmem:[#allocation5 + $0x1c0] sm:$0xff] }
  0x3a   :  { %1195 = vmatprep.subr.bf16.mxu0 %v1194_v37  ;;  %v116_v13 = vld [vmem:[#allocation5 + $0x1e0] sm:$0xff]  ;;  %v121_v14 = vld [vmem:[#allocation5 + $0x208] sm:$0xff]  ;;  %v1260_v15 = vpack.c.bf16 %v94_v7, %v90_v6  ;;  %v1262_v17 = vpack.c.bf16 %v103_v9, %v99_v8  ;;  %v98_v18 = vld [vmem:[#allocation5 + $0x150] sm:$0xff] }
  0x3b   :  { %1257 = vmatpush1.bf16.msra.mxu1 %v1256_v3  ;;  %v125_v16 = vld [vmem:[#allocation5 + $0x228] sm:$0xff]  ;;  %v102_v19 = vld [vmem:[#allocation5 + $0x170] sm:$0xff]  ;;  %v107_v20 = vld [vmem:[#allocation5 + $0x198] sm:$0xff]  ;;  %v1208_v22 = vpack.c.bf16 %v116_v13, %v112_v12 }
  0x3c   :  { %1259 = vmatprep.subr.bf16.mxu1 %v1258_v5  ;;  %v111_v21 = vld [vmem:[#allocation5 + $0x1b8] sm:$0xff]  ;;  %v1210_v23 = vpack.c.bf16 %v125_v16, %v121_v14  ;;  %v120_v24 = vld [vmem:[#allocation5 + $0x200] sm:$0xff]  ;;  %v129_v26 = vld [vmem:[#allocation5 + $0x248] sm:$0xff]  ;;  %v1264_v27 = vpack.c.bf16 %v102_v19, %v98_v18 }
  0x3d   :  { %1197 = vmatpush1.bf16.msra.mxu0 %v1196_v48  ;;  %v124_v25 = vld [vmem:[#allocation5 + $0x220] sm:$0xff]  ;;  %v133_v28 = vld [vmem:[#allocation5 + $0x268] sm:$0xff]  ;;  %v1266_v29 = vpack.c.bf16 %v111_v21, %v107_v20  ;;  %v106_v30 = vld [vmem:[#allocation5 + $0x190] sm:$0xff] }
  0x3e   :  { %1199 = vmatprep.subr.bf16.mxu0 %v1198_v51  ;;  %v110_v31 = vld [vmem:[#allocation5 + $0x1b0] sm:$0xff]  ;;  %v115_v32 = vld [vmem:[#allocation5 + $0x1d8] sm:$0xff]  ;;  %v1212_v34 = vpack.c.bf16 %v124_v25, %v120_v24  ;;  %v128_v35 = vld [vmem:[#allocation5 + $0x240] sm:$0xff]  ;;  %v1214_v36 = vpack.c.bf16 %v133_v28, %v129_v26 }
  0x3f   :  { %1261 = vmatpush1.bf16.msra.mxu1 %v1260_v15  ;;  %v119_v33 = vld [vmem:[#allocation5 + $0x1f8] sm:$0xff]  ;;  %v132_v37 = vld [vmem:[#allocation5 + $0x260] sm:$0xff]  ;;  %v137_v38 = vld [vmem:[#allocation5 + $0x288] sm:$0xff]  ;;  %v1268_v40 = vpack.c.bf16 %v110_v31, %v106_v30 }
  0x40   :  { %1263 = vmatprep.subr.bf16.mxu1 %v1262_v17  ;;  %v141_v39 = vld [vmem:[#allocation5 + $0x2a8] sm:$0xff]  ;;  %v1270_v41 = vpack.c.bf16 %v119_v33, %v115_v32  ;;  %v114_v42 = vld [vmem:[#allocation5 + $0x1d0] sm:$0xff]  ;;  %v1529_v44 = vld [vmem:[%s1665_s2] sm:$0x3]  ;;  %v1216_v47 = vpack.c.bf16 %v132_v37, %v128_v35 }
  0x41   :  { %1201 = vmatpush1.bf16.msra.mxu0 %v1200_v62  ;;  %v118_v43 = vld [vmem:[#allocation5 + $0x1f0] sm:$0xff]  ;;  %v123_v45 = vld [vmem:[#allocation5 + $0x218] sm:$0xff]  ;;  %270 = vmatprep.mubr.f32.mxu0 %v1529_v44  ;;  %v1218_v48 = vpack.c.bf16 %v141_v39, %v137_v38  ;;  %v136_v49 = vld [vmem:[#allocation5 + $0x280] sm:$0xff] }
  0x42   :  { %1203 = vmatprep.subr.bf16.mxu0 %v1202_v63  ;;  %v127_v46 = vld [vmem:[#allocation5 + $0x238] sm:$0xff]  ;;  %341 = vmatprep.mubr.f32.mxu1 %v1529_v44  ;;  %v140_v50 = vld [vmem:[#allocation5 + $0x2a0] sm:$0xff]  ;;  %v145_v51 = vld [vmem:[#allocation5 + $0x2c8] sm:$0xff]  ;;  %v1272_v52 = vpack.c.bf16 %v118_v43, %v114_v42 }
  0x43   :  { %1265 = vmatpush1.bf16.msra.mxu1 %v1264_v27  ;;  %v149_v53 = vld [vmem:[#allocation5 + $0x2e8] sm:$0xff]  ;;  %v1274_v54 = vpack.c.bf16 %v127_v46, %v123_v45  ;;  %v122_v55 = vld [vmem:[#allocation5 + $0x210] sm:$0xff]  ;;  %v131_v57 = vld [vmem:[#allocation5 + $0x258] sm:$0xff]  ;;  %v1220_v59 = vpack.c.bf16 %v140_v50, %v136_v49 }
  0x44   :  { %1267 = vmatprep.subr.bf16.mxu1 %v1266_v29  ;;  %v126_v56 = vld [vmem:[#allocation5 + $0x230] sm:$0xff]  ;;  %v135_v58 = vld [vmem:[#allocation5 + $0x278] sm:$0xff]  ;;  %v1222_v60 = vpack.c.bf16 %v149_v53, %v145_v51  ;;  %v144_v61 = vld [vmem:[#allocation5 + $0x2c0] sm:$0xff] }
  0x45   :  { %1205 = vmatpush1.bf16.msra.mxu0 %v1204_v10  ;;  %v148_v62 = vld [vmem:[#allocation5 + $0x2e0] sm:$0xff]  ;;  %v153_v63 = vld [vmem:[#allocation5 + $0x308] sm:$0xff]  ;;  %v1276_v0 = vpack.c.bf16 %v126_v56, %v122_v55  ;;  %v1278_v2 = vpack.c.bf16 %v135_v58, %v131_v57  ;;  %v130_v3 = vld [vmem:[#allocation5 + $0x250] sm:$0xff] }
  0x46   :  { %1207 = vmatprep.subr.bf16.mxu0 %v1206_v11  ;;  %v157_v1 = vld [vmem:[#allocation5 + $0x328] sm:$0xff]  ;;  %v134_v4 = vld [vmem:[#allocation5 + $0x270] sm:$0xff]  ;;  %v152_v5 = vld [vmem:[#allocation5 + $0x300] sm:$0xff]  ;;  %v1224_v9 = vpack.c.bf16 %v148_v62, %v144_v61 }
  0x47   :  { %1269 = vmatpush1.bf16.msra.mxu1 %v1268_v40  ;;  %v156_v6 = vld [vmem:[#allocation5 + $0x320] sm:$0xff]  ;;  %v139_v7 = vld [vmem:[#allocation5 + $0x298] sm:$0xff]  ;;  %v161_v10 = vld [vmem:[#allocation5 + $0x348] sm:$0xff]  ;;  %v1226_v14 = vpack.c.bf16 %v157_v1, %v153_v63  ;;  %v1280_v15 = vpack.c.bf16 %v134_v4, %v130_v3 }
  0x48   :  { %1271 = vmatprep.subr.bf16.mxu1 %v1270_v41  ;;  %v143_v8 = vld [vmem:[#allocation5 + $0x2b8] sm:$0xff]  ;;  %v165_v11 = vld [vmem:[#allocation5 + $0x368] sm:$0xff]  ;;  %v138_v12 = vld [vmem:[#allocation5 + $0x290] sm:$0xff]  ;;  %v1228_v21 = vpack.c.bf16 %v156_v6, %v152_v5  ;;  %v1456_v5 = vmov 0.0   ;;  %v186_v6 = vlaneseq }
  0x49   :  { %1209 = vmatpush1.bf16.msra.mxu0 %v1208_v22  ;;  %v142_v13 = vld [vmem:[#allocation5 + $0x2b0] sm:$0xff]  ;;  %v147_v16 = vld [vmem:[#allocation5 + $0x2d8] sm:$0xff]  ;;  %v1282_v18 = vpack.c.bf16 %v143_v8, %v139_v7  ;;  %v160_v19 = vld [vmem:[#allocation5 + $0x340] sm:$0xff]  ;;  %v1230_v24 = vpack.c.bf16 %v165_v11, %v161_v10 }
  0x4a   :  { %1211 = vmatprep.subr.bf16.mxu0 %v1210_v23  ;;  %v151_v17 = vld [vmem:[#allocation5 + $0x2f8] sm:$0xff]  ;;  %v164_v20 = vld [vmem:[#allocation5 + $0x360] sm:$0xff]  ;;  %v169_v22 = vld [vmem:[#allocation5 + $0x388] sm:$0xff]  ;;  %v1284_v25 = vpack.c.bf16 %v142_v13, %v138_v12  ;;  %v1544_v7 = vshrl.u32 %v186_v6, 7 }
  0x4b   :  { %1273 = vmatpush1.bf16.msra.mxu1 %v1272_v52  ;;  %v173_v23 = vld [vmem:[#allocation5 + $0x3a8] sm:$0xff]  ;;  %v1286_v26 = vpack.c.bf16 %v151_v17, %v147_v16  ;;  %v146_v27 = vld [vmem:[#allocation5 + $0x2d0] sm:$0xff]  ;;  %v155_v29 = vld [vmem:[#allocation5 + $0x318] sm:$0xff]  ;;  %v1232_v31 = vpack.c.bf16 %v164_v20, %v160_v19 }
  0x4c   :  { %1275 = vmatprep.subr.bf16.mxu1 %v1274_v54  ;;  %v150_v28 = vld [vmem:[#allocation5 + $0x2f0] sm:$0xff]  ;;  %v159_v30 = vld [vmem:[#allocation5 + $0x338] sm:$0xff]  ;;  %v1234_v32 = vpack.c.bf16 %v173_v23, %v169_v22  ;;  %v168_v33 = vld [vmem:[#allocation5 + $0x380] sm:$0xff]  ;;  %v188_v8 = vsub.s32 0, %v1544_v7  ;;  %v192_v10 = vsub.s32 1, %v1544_v7  ;;  %v200_v23 = vsub.s32 3, %v1544_v7 }
  0x4d   :  { %1213 = vmatpush1.bf16.msra.mxu0 %v1212_v34  ;;  %v172_v34 = vld [vmem:[#allocation5 + $0x3a0] sm:$0xff]  ;;  %v177_v35 = vld [vmem:[#allocation5 + $0x3c8] sm:$0xff]  ;;  %v1290_v38 = vpack.c.bf16 %v159_v30, %v155_v29  ;;  %v154_v39 = vld [vmem:[#allocation5 + $0x310] sm:$0xff] }
  0x4e   :  { %1215 = vmatprep.subr.bf16.mxu0 %v1214_v36  ;;  %v1288_v36 = vpack.c.bf16 %v150_v28, %v146_v27  ;;  %v181_v37 = vld [vmem:[#allocation5 + $0x3e8] sm:$0xff]  ;;  %v158_v40 = vld [vmem:[#allocation5 + $0x330] sm:$0xff]  ;;  %v163_v41 = vld [vmem:[#allocation5 + $0x358] sm:$0xff]  ;;  %v1236_v43 = vpack.c.bf16 %v172_v34, %v168_v33  ;;  %v1458_v34 = vmov 1966171168  }
  0x4f   :  { %1277 = vmatpush1.bf16.msra.mxu1 %v1276_v0  ;;  %v167_v42 = vld [vmem:[#allocation5 + $0x378] sm:$0xff]  ;;  %v1238_v45 = vpack.c.bf16 %v181_v37, %v177_v35  ;;  %v176_v46 = vld [vmem:[#allocation5 + $0x3c0] sm:$0xff]  ;;  %v162_v50 = vld [vmem:[#allocation5 + $0x350] sm:$0xff]  ;;  %v373_v35 = vunpack.c.l.s4 %v1458_v34 }
  0x50   :  { %1279 = vmatprep.subr.bf16.mxu1 %v1278_v2  ;;  %v1294_v49 = vpack.c.bf16 %v167_v42, %v163_v41  ;;  %v166_v51 = vld [vmem:[#allocation5 + $0x370] sm:$0xff]  ;;  %v171_v52 = vld [vmem:[#allocation5 + $0x398] sm:$0xff]  ;;  %v54_v61 = vld [vmem:[%s1664_s1] sm:$0x3] }
  0x51   :  { %1217 = vmatpush1.bf16.msra.mxu0 %v1216_v47  ;;  %v180_v47 = vld [vmem:[#allocation5 + $0x3e0] sm:$0xff]  ;;  %v175_v53 = vld [vmem:[#allocation5 + $0x3b8] sm:$0xff]  ;;  %v1296_v55 = vpack.c.bf16 %v166_v51, %v162_v50  ;;  %v170_v57 = vld [vmem:[#allocation5 + $0x390] sm:$0xff]  ;;  %v374_v37 = vunpack.c.0.s8 %v373_v35  ;;  %v1575_v51 = vand.u32 127, %v186_v6 }
  0x52   :  { %1219 = vmatprep.subr.bf16.mxu0 %v1218_v48  ;;  %v1292_v48 = vpack.c.bf16 %v158_v40, %v154_v39  ;;  %v1240_v54 = vpack.c.bf16 %v180_v47, %v176_v46  ;;  %v1298_v56 = vpack.c.bf16 %v175_v53, %v171_v52  ;;  %v174_v58 = vld [vmem:[#allocation5 + $0x3b0] sm:$0xff]  ;;  %v1318_v3 = vld [vmem:[#allocation2] sm:$0xff]   ;;  %v1319_v4 = vld [vmem:[#allocation2 + $0x8] sm:$0xff]  }
  0x53   :  { %1281 = vmatpush1.bf16.msra.mxu1 %v1280_v15  ;;  %v1300_v62 = vpack.c.bf16 %v174_v58, %v170_v57  ;;  %v178_v0 = vld [vmem:[#allocation5 + $0x3d0] sm:$0xff]  ;;  %v1554_v40 = vsub.s32 %v374_v37, %v1544_v7  ;;  %vm370_vm1 = vcmp.lt.s32.totalorder %v1575_v51, 8 }
  0x54   :  { %1283 = vmatprep.subr.bf16.mxu1 %v1282_v18  ;;  %v182_v1 = vld [vmem:[#allocation5 + $0x3f0] sm:$0xff] }
  0x55   :  { %1221 = vmatpush1.bf16.msra.mxu0 %v1220_v59  ;;  %v179_v59 = vld [vmem:[#allocation5 + $0x3d8] sm:$0xff]  ;;  %v1304_v2 = vpack.c.bf16 %v182_v1, %v178_v0 }
  0x56   :  { %1223 = vmatprep.subr.bf16.mxu0 %v1222_v60  ;;  %v183_v60 = vld [vmem:[#allocation5 + $0x3f8] sm:$0xff] }
  0x57   :  { %1285 = vmatpush1.bf16.msra.mxu1 %v1284_v25  ;;  %v1302_v63 = vpack.c.bf16 %v183_v60, %v179_v59 }
  0x58   :  { %1287 = vmatprep.subr.bf16.mxu1 %v1286_v26 }
  0x59   :  { %1225 = vmatpush1.bf16.msra.mxu0 %v1224_v9  ;;  %v184_v9 = vld [vmem:[%s1667_s4] sm:$0xf] }
  0x5a   :  { %1227 = vmatprep.subr.bf16.mxu0 %v1226_v14  ;;  %v189_v11 = vrot.slane %v184_v9, %v188_v8  ;;  %v193_v13 = vrot.slane %v184_v9, %v192_v10  ;;  %v201_v25 = vrot.slane %v184_v9, %v200_v23  ;;  %v1323_v23 = vld [vmem:[#allocation2 + $0x10] sm:$0xff]  }
  0x5b   :  { %1289 = vmatpush1.bf16.msra.mxu1 %v1288_v36 }
  0x5c   :  { %1291 = vmatprep.subr.bf16.mxu1 %v1290_v38 }
  0x5d   :  { %1229 = vmatpush1.bf16.msra.mxu0 %v1228_v21 }
  0x5e   :  { %1231 = vmatprep.subr.bf16.mxu0 %v1230_v24  ;;  %v196_v24 = vsub.s32 2, %v1544_v7 }
  0x5f   :  { %1293 = vmatpush1.bf16.msra.mxu1 %v1292_v48 }
  0x60   :  { %1295 = vmatprep.subr.bf16.mxu1 %v1294_v49  ;;  %v197_v28 = vrot.slane %v184_v9, %v196_v24  ;;  %v1459_v24 = vmov 1935823168  }
  0x61   :  { %1233 = vmatpush1.bf16.msra.mxu0 %v1232_v31 }
  0x62   :  { %1235 = vmatprep.subr.bf16.mxu0 %v1234_v32 }
  0x63   :  { %1297 = vmatpush1.bf16.msra.mxu1 %v1296_v55 }
  0x64   :  { %1299 = vmatprep.subr.bf16.mxu1 %v1298_v56 }
  0x65   :  { %1237 = vmatpush1.bf16.msra.mxu0 %v1236_v43 }
  0x66   :  { %1239 = vmatprep.subr.bf16.mxu0 %v1238_v45 }
  0x67   :  { %1301 = vmatpush1.bf16.msra.mxu1 %v1300_v62 }
  0x68   :  { %1303 = vmatprep.subr.bf16.mxu1 %v1302_v63 }
  0x69   :  { %1241 = vmatpush1.bf16.msra.mxu0 %v1240_v54 }
  0x6a   :  { %1118 = vmatprep.subr.bf16.mxu0 %v1456_v5 }
  0x6b   :  { %1305 = vmatpush1.bf16.msra.mxu1 %v1304_v2 }
  0x6c   :  { %271 = vmatmul.mubr.f32.vlgmr.msra.gmra.mrb[0].mxu0 %v54_v61  ;;  %1124 = vmatprep.subr.bf16.mxu1 %v1456_v5 }
  0x6d   :  { %1120 = vmatprep.mubr.msk.bf16.mxu0 %vm1457_vm0, %v1456_v5 }
  0x6e   :  { %342 = vmatmul.mubr.f32.vlgmr.msra.gmra.mrb[0].mxu1 %v54_v61 }
  0x6f   :  { %1126 = vmatprep.mubr.msk.bf16.mxu1 %vm1457_vm0, %v1456_v5 }
  0x72   :  { %1119 = vmatpush3.bf16.xpose.msra.mxu0 %v1318_v3 }
  0x73   :  { %1130 = vmatprep.subr.bf16.mxu0 %v1456_v5 }
  0x74   :  { %1125 = vmatpush3.bf16.xpose.msra.mxu1 %v1319_v4 }
  0x75   :  { %1136 = vmatprep.subr.bf16.mxu1 %v1456_v5 }
 0x13f   :  { %v272_v12 = vpop.f32.mrb[0].mxu0 }
 0x140   :  { %v273_v14 = vadd.f32 %v272_v12, %v189_v11  ;;  %v274_v15 = vpop.f32.mrb[1].mxu0  ;;  %v1320_v12 = vld [vmem:[#allocation2 + $0x18] sm:$0xff]  }
 0x141   :  { %v275_v17 = vadd.f32 %v274_v15, %v193_v13  ;;  %v343_v19 = vpop.f32.mrb[0].mxu1  ;;  %v1321_v13 = vld [vmem:[#allocation2 + $0x10] sm:$0xff]  }
 0x142   :  { %v1081_v16 = vmul.f32 -1.442695, %v273_v14  ;;  %v345_v20 = vpop.f32.mrb[1].mxu1  ;;  %v344_v31 = vadd.f32 %v343_v19, %v197_v28 }
 0x143   :  { %v1082_v18 = vmul.f32 -1.442695, %v275_v17  ;;  %v346_v29 = vadd.f32 %v345_v20, %v201_v25  ;;  %v999_v25 = vunpack.c.l.s4 %v1459_v24 }
 0x144   :  { %1328 = vpow2.f32 %v1081_v16 }
 0x145   :  { %1330 = vpow2.f32 %v1082_v18  ;;  %v1322_v18 = vld [vmem:[#allocation2 + $0x18] sm:$0xff]  }
 0x14e   :  { %v1329_v21 = vpop.eup %1328 }
 0x14f   :  { %v351_v22 = vadd.f32 1.0, %v1329_v21  ;;  %v1331_v26 = vpop.eup %1330 }
 0x150   :  { %v357_v27 = vadd.f32 1.0, %v1331_v26  ;;  %v1000_v26 = vunpack.c.0.s8 %v999_v25 }
 0x151   :  { %1332 = vrcp.f32 %v351_v22 }
 0x152   :  { %1334 = vrcp.f32 %v357_v27  ;;  %v1003_v34 = vsub.s32 %v1000_v26, %v1544_v7  ;;  %v1327_v26 = vld [vmem:[#allocation2 + $0x20] sm:$0xff]  }
 0x15b   :  { %v1333_v30 = vpop.eup %1332 }
 0x15c   :  { %v360_v32 = vmul.f32 %v1333_v30, %v346_v29  ;;  %v1335_v36 = vpop.eup %1334 }
 0x15d   :  { %v363_v38 = vsub.f32 1.0, %v1335_v36  ;;  %v365_v41 = vmul.f32 %v1335_v36, %v1529_v44 }
 0x15e   :  { %v361_v33 = vadd.f32 %v360_v32, %v344_v31 }
 0x160   :  { %1336 = vtanh.f32 %v361_v33 }
 0x16a   :  { %v1337_v39 = vpop.eup %1336 }
 0x16b   :  { %v364_v42 = vmul.f32 %v1337_v39, %v363_v38 }
 0x16d   :  { %v366_v43 = vadd.f32 %v365_v41, %v364_v42 }
 0x16f   :  { %v378_v45 = vrot.slane %v366_v43, %v1554_v40  ;;  %v964_v46 = vpack.c.bf16 %v366_v43, %v366_v43  ;;  %367 = vst [vmem:[#allocation8] sm:$0x3] %v366_v43 }
 0x171   :  { %v1559_v47 = vrot.slane %v378_v45, %v1554_v40  ;;  %965 = vst [vmem:[%s1670_s7] sm:$0x1] %v964_v46  ;;  %v379_v48 = vcombine.high %v378_v45, %v378_v45 }
 0x173   :  { %v405_v49 = vpack.c.bf16 %v1559_v47, %v1559_v47  ;;  %v1567_v50 = vrot.slane %v379_v48, %v1554_v40 }
 0x175   :  { %1121 = vmatmul.mubr.bf16.vlgmr.msra.gmra.mrb[4].mxu0 %v405_v49  ;;  %v406_v44 = vpack.c.bf16 %v1567_v50, %v1567_v50 }
 0x176   :  { %1132 = vmatprep.mubr.msk.bf16.mxu0 %vm1457_vm0, %v1456_v5  ;;  %1131 = vmatpush3.bf16.msra.mxu0 %v1321_v13 }
 0x177   :  { %1127 = vmatmul.mubr.bf16.vlgmr.msra.gmra.mrb[4].mxu1 %v406_v44  ;;  %1142 = vmatprep.subr.bf16.mxu0 %v1456_v5 }
 0x178   :  { %1138 = vmatprep.mubr.msk.bf16.mxu1 %vm1457_vm0, %v1456_v5  ;;  %1137 = vmatpush3.bf16.msra.mxu1 %v1320_v12 }
 0x179   :  { %1148 = vmatprep.subr.bf16.mxu1 %v1456_v5 }
 0x248   :  { %v447_v52 = vpop.f32.mrb[4].mxu0 }
 0x249   :  { %v1122_v53 = vpop.f32.mrb[5].mxu0  ;;  %v501_v61 = vsel %vm370_vm1, %v447_v52, -1e+30 }
 0x24a   :  { %v450_v54 = vpop.f32.mrb[6].mxu0  ;;  %v493_v55 = vpop.f32.mrb[4].mxu1  ;;  %v504_v63 = vsel %vm503_vm2, %v501_v61, -inf }
 0x24b   :  { %v502_v56 = vsel %vm370_vm1, %v493_v55, -1e+30  ;;  %v1123_v57 = vpop.f32.mrb[7].mxu0  ;;  %v1128_v58 = vpop.f32.mrb[5].mxu1 }
 0x24c   :  { %v496_v59 = vpop.f32.mrb[6].mxu1  ;;  %v507_v60 = vsel %vm503_vm2, %v502_v56, -inf }
 0x24d   :  { %508 = vmax.xlane.f32.xlu0 %v507_v60  ;;  %v1129_v62 = vpop.f32.mrb[7].mxu1 }
 0x251   :  { %505 = vmax.xlane.f32.xlu0 %v504_v63 }
 0x2da   :  { %v509_v0 = vpop.xlane.xlu0 %508 }
 0x2db   :  { %v511_v1 = vsub.f32 %v502_v56, %v509_v0 }
 0x2dd   :  { %v514_v2 = vmul.f32 1.442695, %v511_v1 }
 0x2de   :  { %v506_v3 = vpop.xlane.xlu0 %505 }
 0x2df   :  { %1338 = vpow2.f32 %v514_v2  ;;  %v510_v4 = vsub.f32 %v501_v61, %v506_v3 }
 0x2e1   :  { %v512_v6 = vmul.f32 1.442695, %v510_v4 }
 0x2e3   :  { %1340 = vpow2.f32 %v512_v6 }
 0x2e9   :  { %v1339_v8 = vpop.eup %1338 }
 0x2ea   :  { %v519_v9 = vsel %vm503_vm2, %v1339_v8, 0.0 }
 0x2eb   :  { %520 = vadd.xlane.f32.xlu1 %v519_v9 }
 0x2ed   :  { %v1341_v10 = vpop.eup %1340 }
 0x2ee   :  { %v516_v11 = vsel %vm503_vm2, %v1341_v10, 0.0 }
 0x2ef   :  { %517 = vadd.xlane.f32.xlu1 %v516_v11 }
 0x378   :  { %v521_v14 = vpop.xlane.xlu1 %520 }
 0x379   :  { %1342 = vrcp.f32 %v521_v14 }
 0x37c   :  { %v518_v15 = vpop.xlane.xlu1 %517 }
 0x37d   :  { %1344 = vrcp.f32 %v518_v15  ;;  %v1324_v15 = vld [vmem:[#allocation2 + $0x28] sm:$0xff]  }
 0x383   :  { %v1343_v16 = vpop.eup %1342 }
 0x384   :  { %v525_v17 = vmul.f32 %v1343_v16, %v1339_v8  ;;  %v1325_v16 = vld [vmem:[#allocation2 + $0x20] sm:$0xff]  }
 0x386   :  { %v527_v19 = vpack.c.bf16 %v525_v17, %v525_v17 }
 0x387   :  { %v1345_v20 = vpop.eup %1344 }
 0x388   :  { %v523_v21 = vmul.f32 %v1345_v20, %v1341_v10  ;;  %1139 = vmatmul.mubr.msk.bf16.vlgmr.msra.gmra.mrb[8].mxu1 %vm534_vm3, %v527_v19 }
 0x389   :  { %1149 = vmatpush3.bf16.xpose.msra.mxu1 %v1322_v18  ;;  %1150 = vmatprep.mubr.msk.bf16.mxu1 %vm1457_vm0, %v1456_v5 }
 0x38a   :  { %v526_v22 = vpack.c.bf16 %v523_v21, %v523_v21  ;;  %1160 = vmatprep.subr.bf16.mxu1 %v1456_v5  ;;  %v1326_v21 = vld [vmem:[#allocation2 + $0x28] sm:$0xff]  }
 0x38c   :  { %1133 = vmatmul.mubr.msk.bf16.vlgmr.msra.gmra.mrb[8].mxu0 %vm534_vm3, %v526_v22 }
 0x38d   :  { %1144 = vmatprep.mubr.msk.bf16.mxu0 %vm1457_vm0, %v1456_v5  ;;  %1143 = vmatpush3.bf16.xpose.msra.mxu0 %v1323_v23 }
 0x38e   :  { %1154 = vmatprep.subr.bf16.mxu0 %v1456_v5 }
 0x45b   :  { %v621_v27 = vpop.f32.mrb[8].mxu1 }
 0x45c   :  { %v1597_v28 = vadd.f32 %v621_v27, %v1567_v50  ;;  %v967_v29 = vpack.c.bf16 %v621_v27, %v621_v27  ;;  %v1140_v30 = vpop.f32.mrb[9].mxu1 }
 0x45d   :  { %v624_v31 = vpop.f32.mrb[10].mxu1 }
 0x45e   :  { %v639_v32 = vpack.c.bf16 %v1597_v28, %v1597_v28  ;;  %v990_v33 = vrot.slane %v967_v29, %v1554_v40  ;;  %v1141_v35 = vpop.f32.mrb[11].mxu1 }
 0x45f   :  { %v572_v36 = vpop.f32.mrb[8].mxu0 }
 0x460   :  { %v997_v37 = vrot.slane %v990_v33, %v1554_v40  ;;  %v1605_v38 = vadd.f32 %v572_v36, %v1559_v47  ;;  %v966_v39 = vpack.c.bf16 %v572_v36, %v572_v36  ;;  %v1134_v41 = vpop.f32.mrb[9].mxu0  ;;  %1151 = vmatmul.mubr.bf16.vlgmr.msra.gmra.mrb[12].mxu1 %v639_v32 }
 0x461   :  { %v575_v42 = vpop.f32.mrb[10].mxu0  ;;  %1162 = vmatprep.mubr.msk.bf16.mxu1 %vm1457_vm0, %v1456_v5  ;;  %1161 = vmatpush3.bf16.msra.mxu1 %v1324_v15 }
 0x462   :  { %v1018_v43 = vrot.slane %v997_v37, %v1003_v34  ;;  %v638_v45 = vpack.c.bf16 %v1605_v38, %v1605_v38  ;;  %v976_v7 = vrot.slane %v966_v39, %v1554_v40  ;;  %v1135_v46 = vpop.f32.mrb[11].mxu0  ;;  %1172 = vmatprep.subr.bf16.mxu1 %v1456_v5 }
 0x464   :  { %v1025_v48 = vrot.slane %v1018_v43, %v1003_v34  ;;  %v983_v49 = vrot.slane %v976_v7, %v1554_v40  ;;  %1145 = vmatmul.mubr.bf16.vlgmr.msra.gmra.mrb[12].mxu0 %v638_v45 }
 0x465   :  { %1156 = vmatprep.mubr.msk.bf16.mxu0 %vm1457_vm0, %v1456_v5  ;;  %1155 = vmatpush3.bf16.msra.mxu0 %v1325_v16 }
 0x466   :  { %v1027_v47 = vunpack.c.l.b16 %v1025_v48  ;;  %v1004_v50 = vrot.slane %v983_v49, %v1003_v34  ;;  %1166 = vmatprep.subr.bf16.mxu0 %v1456_v5 }
 0x468   :  { %v1011_v44 = vrot.slane %v1004_v50, %v1003_v34  ;;  %v1028_v53 = vrot.slane %v1027_v47, 7 }
 0x46a   :  { %v1026_v52 = vunpack.c.l.b16 %v1011_v44 }
 0x46c   :  { %v1029_v54 = vsel %vm959_vm4, %v1028_v53, %v1026_v52 }
 0x46d   :  { %v1030_v55 = vpack.c.b16 %v1029_v54, %v1029_v54 }
 0x46f   :  { %v1037_v56 = vrot.slane %v1030_v55, %v1554_v40 }
 0x471   :  { %1097 = vst.sshfl [vmem:[%s1670_s7 + $0x1] sm:$0x1 pattern:$0x73625140] %v1037_v56  ;;  %s1460_s7 = smov [#allocation8]  }
 0x472   :  { %s1063_s11 = sshll.u32 %s1460_s7, 4  ;;  %s1064_s11 = int_to_ptr.vmem [resolvable:$true] %s1063_s11 }
 0x473   :  { %s1398_s12 = scalar_lea.vmem %s1064_s11, 32  ;;  %p1403_p3 = scmp.lt.s32.totalorder %s1064_s11, %s1064_s11 }
 0x474   :  { %p1399_p2 = scmp.ne.s32.totalorder %s1064_s11, %s1398_s12  ;;  %p1404_p4 = scmp.lt.s32.totalorder %s1398_s12, %s1398_s12 }
 0x476   :  { %p1405_p5 = por %p1404_p4, %p1403_p3 }
 0x478   :  { %p1406_p6 = pnand %p1405_p5, %p1399_p2 }
 0x533   :  { %v726_v57 = vpop.f32.mrb[12].mxu1 }
 0x534   :  { %v733_v58 = vsel %vm370_vm1, %v726_v57, -1e+30  ;;  %v1152_v59 = vpop.f32.mrb[13].mxu1 }
 0x535   :  { %v729_v60 = vpop.f32.mrb[14].mxu1  ;;  %v737_v61 = vsel %vm503_vm2, %v733_v58, -inf }
 0x536   :  { %738 = vmax.xlane.f32.xlu0 %v737_v61  ;;  %v1153_v62 = vpop.f32.mrb[15].mxu1 }
 0x537   :  { %v680_v63 = vpop.f32.mrb[12].mxu0 }
 0x538   :  { %v732_v0 = vsel %vm370_vm1, %v680_v63, -1e+30  ;;  %v1146_v1 = vpop.f32.mrb[13].mxu0 }
 0x539   :  { %v683_v40 = vpop.f32.mrb[14].mxu0  ;;  %v734_v2 = vsel %vm503_vm2, %v732_v0, -inf }
 0x53a   :  { %735 = vmax.xlane.f32.xlu1 %v734_v2  ;;  %v1147_v3 = vpop.f32.mrb[15].mxu0 }
 0x5c3   :  { %v739_v4 = vpop.xlane.xlu0 %738 }
 0x5c4   :  { %v741_v6 = vsub.f32 %v733_v58, %v739_v4 }
 0x5c6   :  { %v744_v8 = vmul.f32 1.442695, %v741_v6 }
 0x5c7   :  { %v736_v9 = vpop.xlane.xlu1 %735 }
 0x5c8   :  { %1346 = vpow2.f32 %v744_v8  ;;  %v740_v10 = vsub.f32 %v732_v0, %v736_v9 }
 0x5ca   :  { %v742_v11 = vmul.f32 1.442695, %v740_v10 }
 0x5cc   :  { %1348 = vpow2.f32 %v742_v11 }
 0x5d2   :  { %v1347_v12 = vpop.eup %1346 }
 0x5d3   :  { %v749_v13 = vsel %vm503_vm2, %v1347_v12, 0.0 }
 0x5d4   :  { %750 = vadd.xlane.f32.xlu0 %v749_v13 }
 0x5d6   :  { %v1349_v51 = vpop.eup %1348 }
 0x5d7   :  { %v746_v14 = vsel %vm503_vm2, %v1349_v51, 0.0 }
 0x5d8   :  { %747 = vadd.xlane.f32.xlu1 %v746_v14 }
 0x661   :  { %v751_v17 = vpop.xlane.xlu0 %750 }
 0x662   :  { %1350 = vrcp.f32 %v751_v17 }
 0x665   :  { %v748_v18 = vpop.xlane.xlu1 %747 }
 0x666   :  { %1352 = vrcp.f32 %v748_v18 }
 0x66c   :  { %v1351_v19 = vpop.eup %1350 }
 0x66d   :  { %v755_v20 = vmul.f32 %v1351_v19, %v1347_v12 }
 0x66f   :  { %v757_v22 = vpack.c.bf16 %v755_v20, %v755_v20 }
 0x670   :  { %v1353_v23 = vpop.eup %1352 }
 0x671   :  { %v753_v24 = vmul.f32 %v1353_v23, %v1349_v51  ;;  %1163 = vmatmul.mubr.msk.bf16.vlgmr.msra.gmra.mrb[16].mxu1 %vm534_vm3, %v757_v22 }
 0x672   :  { %1173 = vmatpush3.bf16.xpose.msra.mxu1 %v1326_v21  ;;  %1174 = vmatprep.mubr.msk.bf16.mxu1 %vm1457_vm0, %v1456_v5 }
 0x673   :  { %v756_v25 = vpack.c.bf16 %v753_v24, %v753_v24 }
 0x675   :  { %1157 = vmatmul.mubr.msk.bf16.vlgmr.msra.gmra.mrb[16].mxu0 %vm534_vm3, %v756_v25 }
 0x676   :  { %1168 = vmatprep.mubr.msk.bf16.mxu0 %vm1457_vm0, %v1456_v5  ;;  %1167 = vmatpush3.bf16.xpose.msra.mxu0 %v1327_v26 }
 0x744   :  { %v850_v27 = vpop.f32.mrb[16].mxu1 }
 0x745   :  { %v857_v29 = vadd.f32 %v850_v27, %v1597_v28  ;;  %v1164_v30 = vpop.f32.mrb[17].mxu1 }
 0x746   :  { %v853_v31 = vpop.f32.mrb[18].mxu1 }
 0x747   :  { %v863_v32 = vpack.c.bf16 %v857_v29, %v857_v29  ;;  %v1165_v33 = vpop.f32.mrb[19].mxu1 }
 0x748   :  { %v801_v34 = vpop.f32.mrb[16].mxu0 }
 0x749   :  { %v856_v35 = vadd.f32 %v801_v34, %v1605_v38  ;;  %v1158_v36 = vpop.f32.mrb[17].mxu0  ;;  %1175 = vmatmul.mubr.bf16.vlgmr.msra.gmra.mrb[20].mxu1 %v863_v32 }
 0x74a   :  { %v804_v37 = vpop.f32.mrb[18].mxu0 }
 0x74b   :  { %v862_v39 = vpack.c.bf16 %v856_v35, %v856_v35  ;;  %v1159_v41 = vpop.f32.mrb[19].mxu0 }
 0x74d   :  { %1169 = vmatmul.mubr.bf16.vlgmr.msra.gmra.mrb[20].mxu0 %v862_v39 }
 0x74e   :  { %1409 = shalt.err (!%p1406_p6)
}
 0x74f   :  { %s1410_s15 = scalar_lea.hbm %s1669_s6, 32 }
 0x750   :  { %p1411_p7 = scmp.ne.s32.totalorder %s1669_s6, %s1410_s15  ;;  %p1414_p8 = scmp.lt.u32.totalorder %s1410_s15, %s1669_s6 }
 0x752   :  { %p1416_p9 = pnand %p1414_p8, %p1411_p7 }
 0x754   :  { %1419 = shalt.err (!%p1416_p9)
}
 0x755   :  { %1066 = dma.vmem_to_hbm [thread:$0]  %s1064_s11, 32, %s1669_s6, [#allocation9]   ;;  %vm962_vm5 = vcmask 123904  }
 0x756   :  { %s1461_s22 = smov [#allocation7]  }
 0x757   :  { %s1053_s23 = sshll.u32 %s1461_s22, 4  ;;  %s1054_s23 = int_to_ptr.vmem [resolvable:$true] %s1053_s23 }
 0x758   :  { %s1420_s24 = scalar_lea.vmem %s1054_s23, 32  ;;  %p1425_p11 = scmp.lt.s32.totalorder %s1054_s23, %s1054_s23 }
 0x759   :  { %p1421_p10 = scmp.ne.s32.totalorder %s1054_s23, %s1420_s24  ;;  %p1426_p12 = scmp.lt.s32.totalorder %s1420_s24, %s1420_s24 }
 0x75b   :  { %p1427_p13 = por %p1426_p12, %p1425_p11 }
 0x75d   :  { %p1428_p0 = pnand %p1427_p13, %p1421_p10 }
 0x81c   :  { %v950_v5 = vpop.f32.mrb[20].mxu1 }
 0x81d   :  { %v1176_v28 = vpop.f32.mrb[21].mxu1  ;;  %v958_v42 = vrot.slane %v950_v5, 7 }
 0x81e   :  { %v953_v38 = vpop.f32.mrb[22].mxu1 }
 0x81f   :  { %v1177_v43 = vpop.f32.mrb[23].mxu1 }
 0x820   :  { %v904_v45 = vpop.f32.mrb[20].mxu0 }
 0x821   :  { %v960_v7 = vsel %vm959_vm4, %v958_v42, %v904_v45  ;;  %v1170_v46 = vpop.f32.mrb[21].mxu0 }
 0x822   :  { %v907_v48 = vpop.f32.mrb[22].mxu0  ;;  %963 = vst.msk [vmem:[#allocation7] sm:$0x3] %vm962_vm5, %v960_v7 }
 0x823   :  { %v1171_v49 = vpop.f32.mrb[23].mxu0 }
 0x824   :  { %1431 = shalt.err (!%p1428_p0)
}
 0x825   :  { %s1432_s25 = scalar_lea.hbm %s1668_s5, 32 }
 0x826   :  { %p1433_p1 = scmp.ne.s32.totalorder %s1668_s5, %s1432_s25  ;;  %p1436_p2 = scmp.lt.u32.totalorder %s1432_s25, %s1668_s5 }
 0x828   :  { %p1438_p3 = pnand %p1436_p2, %p1433_p1 }
 0x82a   :  { %1441 = shalt.err (!%p1438_p3)
}
 0x82b   :  { %1056 = dma.vmem_to_hbm [thread:$0]  %s1054_s23, 32, %s1668_s5, [#allocation4]  }
 0x82c   :  { %1446 = dma.done.wait [#allocation4], 32  }
 0x82d   :  { %1447 = vsyncadd [#allocation4], 4294967264 }
 0x82e   :  { %1448 = dma.done.wait [#allocation9], 32  }
 0x82f   :  { %1449 = vsyncadd [#allocation9], 4294967264 }
 0x830   :  { %1077 = vsyncpa [#allocation3], 1 }
 0x831   :  { %1078 = vsyncpa [#allocation6], 1 }
 0x832   :  { %1079 = vsyncpa [#allocation4], 1 }
 0x833   :  { %1080 = vsyncpa [#allocation9], 1 }

</bundles_post_ra>
